<compile_context>
chip_gen: v7x
topology: tpu7x:2x2x1
jax: 0.10.0
libtpu: 0.0.40
codegen_flags: <defaults>
</compile_context>

<pallas_src>
import jax
import jax.numpy as jnp
from jax import lax
from jax.experimental import pallas as pl
from jax.experimental.pallas import tpu as pltpu

C_IN = 64
C_OUT = 96
C_OUT_PAD = 128            # conv out-channels zero-padded to a full lane tile
TAPS = 9                   # 3x3 kernel positions
K = TAPS * C_IN            # 576 — fused contraction depth
C_CAT = C_IN + C_OUT       # 160 — [pool(64) | conv(96)]
BN_EPS = 1e-3


def _pick_row_tile(h_out, w_out, target_rows):
    """Largest-quality divisor of h_out so that tile_rows*w_out ~ target_rows."""
    best, best_err = 1, None
    for tr in range(1, h_out + 1):
        if h_out % tr:
            continue
        err = abs(tr * w_out - target_rows)
        if best_err is None or err < best_err or (err == best_err and tr > best):
            best, best_err = tr, err
    return best


def _make_kernel(tr, w_out):
    """Kernel for one tile of `tr` output rows (all w_out cols, one image)."""

    def kernel(xa_ref, xb_ref, w_ref, b_ref, out_ref):
        # xa_ref : (tr, 2, w_out+1, 128) bf16  padded rows [2*oh0, 2*oh0+2*tr)
        #          H paired into (group, row-in-pair); W paired into lanes
        #          (lane = (col % 2) * 64 + cin).
        # xb_ref : (w_out+1, 128)        bf16  halo row 2*(oh0+tr) (even row).
        # w_ref  : (576, 128)            bf16  conv weight, BN scale folded in.
        # b_ref  : (1, 128)              f32   BN bias (beta - mean*scale).
        # out_ref: (tr, w_out, 160)      bf16  [maxpool(64) | conv+BN+ReLU(96)].
        xa = xa_ref[...]                     # (tr, 2, w1, 128)
        r0 = xa[:, 0]                        # padded rows 2t       (tr, w1, 128)
        r1 = xa[:, 1]                        # padded rows 2t + 1
        r_halo = xb_ref[...]                 # padded row  2*tr     (w1, 128)
        if tr > 1:
            r2 = jnp.concatenate([r0[1:], r_halo[None]], axis=0)   # rows 2t + 2
        else:
            r2 = r_halo[None]
        rows = (r0, r1, r2)

        # 9 tap slices, tap = kh*3 + kw; every slice is static and contiguous.
        taps = []
        for kh in range(3):
            for kw in range(3):
                cp = 1 if kw == 2 else 0        # column-pair shift
                lo = C_IN if kw == 1 else 0     # lane offset inside the pair
                taps.append(rows[kh][:, cp:cp + w_out, lo:lo + C_IN])

        # --- maxpool branch: 9-way elementwise max (exact in bf16).  Zero
        # padding equals the true -inf-padded maxpool because the input is
        # post-ReLU (>= 0) in InceptionV4.
        pool = taps[0]
        for t in taps[1:]:
            pool = jnp.maximum(pool, t)
        out_ref[:, :, 0:C_IN] = pool.astype(out_ref.dtype)

        # --- conv branch: one fused K=576 MXU contraction (BN scale folded).
        tmat = jnp.concatenate(taps, axis=-1).reshape(tr * w_out, K)
        acc = jnp.dot(tmat, w_ref[...], preferred_element_type=jnp.float32)
        acc = jnp.maximum(acc + b_ref[...], 0.0)
        conv = acc[:, :C_OUT].astype(out_ref.dtype).reshape(tr, w_out, C_OUT)
        out_ref[:, :, C_IN:C_CAT] = conv

    return kernel


def mixed_3a(x_nchw, w_hwio, gamma, beta, running_mean, running_var, *,
             target_rows=1024, assume_nonneg_input=True, nchw_f32_output=True):
    """Mixed_3a forward (inference-mode BN).

    The pooling branch relies on x >= 0 (true in InceptionV4: Mixed_3a's input
    is the output of stage1's ReLU).  Set nchw_f32_output=False to get the raw
    kernel output (NHWC bf16, channels [pool | conv]) without the extra
    transpose pass.
    """
    if not assume_nonneg_input:
        raise NotImplementedError(
            "zero-padded maxpool == true maxpool only for non-negative input "
            "(always true for Mixed_3a, whose input is post-ReLU).")

    N, C, H, W = x_nchw.shape
    assert C == C_IN
    h_out = (H - 1) // 2 + 1
    w_out = (W - 1) // 2 + 1
    g = h_out + 1                # pair-groups along H (incl. bottom halo group)
    w1 = w_out + 1               # col-pairs along W

    # --- prep: NHWC bf16, zero-pad to (2*(Ho+1), 2*(Wo+1)), pair H and W -----
    x = jnp.transpose(x_nchw, (0, 2, 3, 1)).astype(jnp.bfloat16)
    x = jnp.pad(x, ((0, 0), (1, 2 * g - H - 1), (1, 2 * w1 - W - 1), (0, 0)))
    # Free reshape: x_pairs[n, g, r, wp, wc*64 + c] == x_pad[n, 2g+r, 2wp+wc, c]
    x_pairs = x.reshape(N, g, 2, w1, 2 * C_IN)

    # --- fold BN scale into the conv weight; pad out-channels 96 -> 128 ------
    f32 = jnp.float32
    scale = gamma.astype(f32) / jnp.sqrt(running_var.astype(f32) + BN_EPS)
    bias = beta.astype(f32) - running_mean.astype(f32) * scale
    w_fold = w_hwio.astype(f32).reshape(K, C_OUT) * scale[None, :]
    w_pad = jnp.zeros((K, C_OUT_PAD), f32).at[:, :C_OUT].set(w_fold)
    w_pad = w_pad.astype(jnp.bfloat16)
    b_pad = jnp.zeros((1, C_OUT_PAD), f32).at[0, :C_OUT].set(bias)

    tr = _pick_row_tile(h_out, w_out, target_rows)
    grid = (N, h_out // tr)

    out_nhwc = pl.pallas_call(
        _make_kernel(tr, w_out),
        out_shape=jax.ShapeDtypeStruct((N, h_out, w_out, C_CAT), jnp.bfloat16),
        grid=grid,
        in_specs=[
            # Row stripe: tr pair-groups (= 2*tr padded rows) of one image.
            pl.BlockSpec((None, tr, 2, w1, 2 * C_IN),
                         lambda n, i: (n, i, 0, 0, 0)),
            # Halo: even row 2*(oh0+tr), i.e. pair-group (i+1)*tr, row 0.
            pl.BlockSpec((None, None, None, w1, 2 * C_IN),
                         lambda n, i: (n, (i + 1) * tr, 0, 0, 0)),
            # Weight / bias: constant index maps -> stay resident in VMEM.
            pl.BlockSpec((K, C_OUT_PAD), lambda n, i: (0, 0)),
            pl.BlockSpec((1, C_OUT_PAD), lambda n, i: (0, 0)),
        ],
        out_specs=pl.BlockSpec((None, tr, w_out, C_CAT),
                               lambda n, i: (n, i, 0, 0)),
        compiler_params=pltpu.CompilerParams(
            dimension_semantics=("parallel", "parallel")),
    )(x_pairs, x_pairs, w_pad, b_pad)

    if not nchw_f32_output:
        return out_nhwc
    # Module-faithful output: NCHW f32, channels ordered [pool(64), conv(96)].
    return jnp.transpose(out_nhwc, (0, 3, 1, 2)).astype(f32)


def _reference(x_nchw, w_hwio, gamma, beta, running_mean, running_var):
    """Pure-JAX f32 reference matching the PyTorch module (eval-mode BN)."""
    x = x_nchw.astype(jnp.float32)
    pool = lax.reduce_window(x, -jnp.inf, lax.max,
                             window_dimensions=(1, 1, 3, 3),
                             window_strides=(1, 1, 2, 2),
                             padding=((0, 0), (0, 0), (1, 1), (1, 1)))
    conv = lax.conv_general_dilated(
        x, w_hwio.astype(jnp.float32),
        window_strides=(2, 2), padding=((1, 1), (1, 1)),
        dimension_numbers=("NCHW", "HWIO", "NCHW"))
    scale = gamma / jnp.sqrt(running_var + BN_EPS)
    bias = beta - running_mean * scale
    conv = conv * scale[None, :, None, None] + bias[None, :, None, None]
    conv = jnp.maximum(conv, 0.0)
    return jnp.concatenate([pool, conv], axis=1)


if __name__ == "__main__":
    key = jax.random.PRNGKey(0)
    k_x, k_w, k_g, k_b, k_m, k_v = jax.random.split(key, 6)

    # Mixed_3a sits right after stage1's ReLU in InceptionV4, so its input is
    # non-negative; the demo input reflects that.  Pre-quantize to bf16 so the
    # f32 reference sees exactly the values the bf16 kernel sees.
    x = jnp.maximum(jax.random.normal(k_x, (2, C_IN, 16, 16), jnp.float32), 0.0)
    x = x.astype(jnp.bfloat16).astype(jnp.float32)

    # Conv weight in HWIO (kh, kw, cin, cout); BN params (inference mode).
    w_hwio = jax.random.normal(k_w, (3, 3, C_IN, C_OUT), jnp.float32) * 0.05
    gamma = 1.0 + 0.1 * jax.random.normal(k_g, (C_OUT,), jnp.float32)
    beta = 0.1 * jax.random.normal(k_b, (C_OUT,), jnp.float32)
    running_mean = 0.1 * jax.random.normal(k_m, (C_OUT,), jnp.float32)
    running_var = jax.random.uniform(k_v, (C_OUT,), jnp.float32, 0.5, 1.5)

    out = mixed_3a(x, w_hwio, gamma, beta, running_mean, running_var)
    out = jax.block_until_ready(out)
    assert out.shape == (2, C_CAT, 8, 8), out.shape

    ref = jax.block_until_ready(
        _reference(x, w_hwio, gamma, beta, running_mean, running_var))
    # bf16 taps/weights/output in the kernel vs f32 reference -> bf16 tolerance.
    if not jnp.allclose(out, ref, rtol=2e-2, atol=2e-2):
        max_err = jnp.max(jnp.abs(out - ref))
        raise AssertionError(
            f"Pallas Mixed_3a mismatch vs JAX reference (max abs err {max_err})")

    print("KERNEL_OK")
</pallas_src>

<mosaic_0001>
module attributes {stable_mosaic.version = 11 : i64} {
  func.func @kernel(%arg0: i32, %arg1: i32, %arg2: memref<1x8x2x9x128xbf16, #tpu.memory_space<vmem>>, %arg3: memref<1x1x1x9x128xbf16, #tpu.memory_space<vmem>>, %arg4: memref<576x128xbf16, #tpu.memory_space<vmem>>, %arg5: memref<1x128xf32, #tpu.memory_space<vmem>>, %arg6: memref<1x8x8x160xbf16, #tpu.memory_space<vmem>>) attributes {dimension_semantics = [#tpu.dimension_semantics<parallel>, #tpu.dimension_semantics<parallel>], iteration_bounds = array<i64: 2, 1>, scalar_prefetch = 0 : i64, scratch_operands = 0 : i64, tpu.core_type = #tpu.core_type<tc>, window_params = [{transform_indices = @transform_0, window_bounds = array<i64: 1, 8, 2, 9, 128>}, {transform_indices = @transform_1, window_bounds = array<i64: 1, 1, 1, 9, 128>}, {pipeline_mode = #tpu.pipeline_mode<synchronous>, transform_indices = @transform_2, window_bounds = array<i64: 576, 128>}, {pipeline_mode = #tpu.pipeline_mode<synchronous>, transform_indices = @transform_3, window_bounds = array<i64: 1, 128>}, {transform_indices = @transform_4, window_bounds = array<i64: 1, 8, 8, 160>}]} {
    %c0 = arith.constant 0 : index
    %c0_0 = arith.constant 0 : index
    %c0_1 = arith.constant 0 : index
    %c0_2 = arith.constant 0 : index
    %c0_3 = arith.constant 0 : index
    %0 = vector.load %arg2[%c0, %c0_0, %c0_1, %c0_2, %c0_3] : memref<1x8x2x9x128xbf16, #tpu.memory_space<vmem>>, vector<1x8x2x9x128xbf16>
    %1 = vector.shape_cast %0 : vector<1x8x2x9x128xbf16> to vector<8x2x9x128xbf16>
    %2 = vector.extract_strided_slice %1 {offsets = [0, 0, 0, 0], sizes = [8, 1, 9, 128], strides = [1, 1, 1, 1]} : vector<8x2x9x128xbf16> to vector<8x1x9x128xbf16>
    %3 = vector.shape_cast %2 : vector<8x1x9x128xbf16> to vector<8x9x128xbf16>
    %4 = vector.extract_strided_slice %1 {offsets = [0, 1, 0, 0], sizes = [8, 1, 9, 128], strides = [1, 1, 1, 1]} : vector<8x2x9x128xbf16> to vector<8x1x9x128xbf16>
    %5 = vector.shape_cast %4 : vector<8x1x9x128xbf16> to vector<8x9x128xbf16>
    %c0_4 = arith.constant 0 : index
    %c0_5 = arith.constant 0 : index
    %c0_6 = arith.constant 0 : index
    %c0_7 = arith.constant 0 : index
    %c0_8 = arith.constant 0 : index
    %6 = vector.load %arg3[%c0_4, %c0_5, %c0_6, %c0_7, %c0_8] : memref<1x1x1x9x128xbf16, #tpu.memory_space<vmem>>, vector<1x1x1x9x128xbf16>
    %7 = vector.shape_cast %6 : vector<1x1x1x9x128xbf16> to vector<9x128xbf16>
    %8 = vector.extract_strided_slice %3 {offsets = [1, 0, 0], sizes = [7, 9, 128], strides = [1, 1, 1]} : vector<8x9x128xbf16> to vector<7x9x128xbf16>
    %9 = vector.shape_cast %7 : vector<9x128xbf16> to vector<1x9x128xbf16>
    %10 = tpu.concatenate %8, %9 in 0 : vector<7x9x128xbf16>, vector<1x9x128xbf16> -> vector<8x9x128xbf16>
    %11 = vector.extract_strided_slice %3 {offsets = [0, 0, 0], sizes = [8, 8, 64], strides = [1, 1, 1]} : vector<8x9x128xbf16> to vector<8x8x64xbf16>
    %12 = vector.extract_strided_slice %3 {offsets = [0, 0, 64], sizes = [8, 8, 64], strides = [1, 1, 1]} : vector<8x9x128xbf16> to vector<8x8x64xbf16>
    %13 = vector.extract_strided_slice %3 {offsets = [0, 1, 0], sizes = [8, 8, 64], strides = [1, 1, 1]} : vector<8x9x128xbf16> to vector<8x8x64xbf16>
    %14 = vector.extract_strided_slice %5 {offsets = [0, 0, 0], sizes = [8, 8, 64], strides = [1, 1, 1]} : vector<8x9x128xbf16> to vector<8x8x64xbf16>
    %15 = vector.extract_strided_slice %5 {offsets = [0, 0, 64], sizes = [8, 8, 64], strides = [1, 1, 1]} : vector<8x9x128xbf16> to vector<8x8x64xbf16>
    %16 = vector.extract_strided_slice %5 {offsets = [0, 1, 0], sizes = [8, 8, 64], strides = [1, 1, 1]} : vector<8x9x128xbf16> to vector<8x8x64xbf16>
    %17 = vector.extract_strided_slice %10 {offsets = [0, 0, 0], sizes = [8, 8, 64], strides = [1, 1, 1]} : vector<8x9x128xbf16> to vector<8x8x64xbf16>
    %18 = vector.extract_strided_slice %10 {offsets = [0, 0, 64], sizes = [8, 8, 64], strides = [1, 1, 1]} : vector<8x9x128xbf16> to vector<8x8x64xbf16>
    %19 = vector.extract_strided_slice %10 {offsets = [0, 1, 0], sizes = [8, 8, 64], strides = [1, 1, 1]} : vector<8x9x128xbf16> to vector<8x8x64xbf16>
    %20 = arith.maximumf %11, %12 : vector<8x8x64xbf16>
    %21 = arith.maximumf %20, %13 : vector<8x8x64xbf16>
    %22 = arith.maximumf %21, %14 : vector<8x8x64xbf16>
    %23 = arith.maximumf %22, %15 : vector<8x8x64xbf16>
    %24 = arith.maximumf %23, %16 : vector<8x8x64xbf16>
    %25 = arith.maximumf %24, %17 : vector<8x8x64xbf16>
    %26 = arith.maximumf %25, %18 : vector<8x8x64xbf16>
    %27 = arith.maximumf %26, %19 : vector<8x8x64xbf16>
    %c0_9 = arith.constant 0 : index
    %c0_10 = arith.constant 0 : index
    %c0_11 = arith.constant 0 : index
    %c0_12 = arith.constant 0 : index
    %28 = vector.load %arg6[%c0_9, %c0_10, %c0_11, %c0_12] : memref<1x8x8x160xbf16, #tpu.memory_space<vmem>>, vector<1x8x8x64xbf16>
    %29 = vector.shape_cast %28 : vector<1x8x8x64xbf16> to vector<8x8x64xbf16>
    %30 = vector.shape_cast %27 : vector<8x8x64xbf16> to vector<1x8x8x64xbf16>
    tpu.vector_store %arg6[%c0_9, %c0_10, %c0_11, %c0_12], %30 {strides = array<i32>} : memref<1x8x8x160xbf16, #tpu.memory_space<vmem>>, vector<1x8x8x64xbf16>,
    %31 = tpu.concatenate %11, %12, %13, %14, %15, %16, %17, %18, %19 in 2 : vector<8x8x64xbf16>, vector<8x8x64xbf16>, vector<8x8x64xbf16>, vector<8x8x64xbf16>, vector<8x8x64xbf16>, vector<8x8x64xbf16>, vector<8x8x64xbf16>, vector<8x8x64xbf16>, vector<8x8x64xbf16> -> vector<8x8x576xbf16>
    %32 = vector.shape_cast %31 : vector<8x8x576xbf16> to vector<64x576xbf16>
    %c0_13 = arith.constant 0 : index
    %c0_14 = arith.constant 0 : index
    %33 = vector.load %arg4[%c0_13, %c0_14] : memref<576x128xbf16, #tpu.memory_space<vmem>>, vector<576x128xbf16>
    %cst = arith.constant dense<0.000000e+00> : vector<64x128xf32>
    %34 = tpu.matmul %32, %33, %cst {dimension_numbers = #tpu.dot_dimension_numbers<[1], [0], [0], [1], [0, 0, 1, 1], [], []>} : vector<64x576xbf16>, vector<576x128xbf16>, vector<64x128xf32> -> vector<64x128xf32>
    %c0_15 = arith.constant 0 : index
    %c0_16 = arith.constant 0 : index
    %35 = vector.load %arg5[%c0_15, %c0_16] : memref<1x128xf32, #tpu.memory_space<vmem>>, vector<1x128xf32>
    %36 = vector.broadcast %35 : vector<1x128xf32> to vector<64x128xf32>
    %37 = arith.addf %34, %36 : vector<64x128xf32>
    %cst_17 = arith.constant 0.000000e+00 : f32
    %38 = vector.broadcast %cst_17 : f32 to vector<64x128xf32>
    %39 = arith.maximumf %37, %38 : vector<64x128xf32>
    %40 = vector.extract_strided_slice %39 {offsets = [0, 0], sizes = [64, 96], strides = [1, 1]} : vector<64x128xf32> to vector<64x96xf32>
    %41 = arith.truncf %40 : vector<64x96xf32> to vector<64x96xbf16>
    %42 = vector.shape_cast %41 : vector<64x96xbf16> to vector<8x8x96xbf16>
    %c0_18 = arith.constant 0 : index
    %c0_19 = arith.constant 0 : index
    %c0_20 = arith.constant 0 : index
    %c64 = arith.constant 64 : index
    %43 = vector.load %arg6[%c0_18, %c0_19, %c0_20, %c64] : memref<1x8x8x160xbf16, #tpu.memory_space<vmem>>, vector<1x8x8x96xbf16>
    %44 = vector.shape_cast %43 : vector<1x8x8x96xbf16> to vector<8x8x96xbf16>
    %45 = vector.shape_cast %42 : vector<8x8x96xbf16> to vector<1x8x8x96xbf16>
    tpu.vector_store %arg6[%c0_18, %c0_19, %c0_20, %c64], %45 {strides = array<i32>} : memref<1x8x8x160xbf16, #tpu.memory_space<vmem>>, vector<1x8x8x96xbf16>,
    return
  }
  func.func @transform_0(%arg0: i32, %arg1: i32) -> (i32, i32, i32, i32, i32) {
    %c0_i32 = arith.constant 0 : i32
    %c0_i32_0 = arith.constant 0 : i32
    %c0_i32_1 = arith.constant 0 : i32
    %c0_i32_2 = arith.constant 0 : i32
    return %arg0, %arg1, %c0_i32, %c0_i32_0, %c0_i32_1 : i32, i32, i32, i32, i32
  }
  func.func @transform_1(%arg0: i32, %arg1: i32) -> (i32, i32, i32, i32, i32) {
    %c1_i32 = arith.constant 1 : i32
    %0 = arith.addi %arg1, %c1_i32 : i32
    %c8_i32 = arith.constant 8 : i32
    %1 = arith.muli %0, %c8_i32 : i32
    %c0_i32 = arith.constant 0 : i32
    %c0_i32_0 = arith.constant 0 : i32
    %c0_i32_1 = arith.constant 0 : i32
    %c0_i32_2 = arith.constant 0 : i32
    return %arg0, %1, %c0_i32, %c0_i32_0, %c0_i32_1 : i32, i32, i32, i32, i32
  }
  func.func @transform_2(%arg0: i32, %arg1: i32) -> (i32, i32) {
    %c0_i32 = arith.constant 0 : i32
    %c0_i32_0 = arith.constant 0 : i32
    %c0_i32_1 = arith.constant 0 : i32
    return %c0_i32, %c0_i32_0 : i32, i32
  }
  func.func @transform_3(%arg0: i32, %arg1: i32) -> (i32, i32) {
    %c0_i32 = arith.constant 0 : i32
    %c0_i32_0 = arith.constant 0 : i32
    %c0_i32_1 = arith.constant 0 : i32
    return %c0_i32, %c0_i32_0 : i32, i32
  }
  func.func @transform_4(%arg0: i32, %arg1: i32) -> (i32, i32, i32, i32) {
    %c0_i32 = arith.constant 0 : i32
    %c0_i32_0 = arith.constant 0 : i32
    %c0_i32_1 = arith.constant 0 : i32
    return %arg0, %arg1, %c0_i32, %c0_i32_0 : i32, i32, i32, i32
  }
}

</mosaic_0001>

<bundles_post_ra>
// kernel: tpu_custom_call.1
= control target key start
LH: loop header
LB: loop body
LE: loop exit
PB: predicated region body
PF: predicated region fallthrough
CT: control target
= control target key end

     0   :  { %9 = vsyncpa [#allocation3], 0  ;;  %s3046_s0 = inlined_call_operand.vmem [shape: bf16[2,9,2,9,128], index: 0, kind: input, shape index: {}]   ;;  %s3047_s1 = inlined_call_operand.vmem [shape: bf16[2,9,2,9,128], index: 1, kind: input, shape index: {}]   ;;  %s3048_s2 = inlined_call_operand.vmem [shape: bf16[576,128], index: 2, kind: input, shape index: {}]   ;;  %s3049_s3 = inlined_call_operand.vmem [shape: f32[1,128], index: 3, kind: input, shape index: {}]   ;;  %s3050_s4 = inlined_call_operand.hbm [shape: bf16[2,8,8,160], index: 4, kind: output, shape index: {}]  }
   0x1   :  { %11 = vsyncpa [#allocation3 + $0x1], 0  ;;  %s2280_s15 = smov 0   ;;  %s2282_s16 = smov 0  }
   0x2   :  { %s2284_s17 = smov 0   ;;  %s2286_s18 = smov 0  }
   0x3   :  { %s2288_s19 = smov 0   ;;  %s2290_s20 = smov 0  }
   0x4 LB: > { %s1810_s21 = sadd.s32 4294967295, %s2249_s20   ;;  %s1811_s22 = sadd.s32 4294967294, %s2249_s20   ;;  %s2249_s20 = sphi %s2290_s20, %s17_s20   ;;  %s2245_s19 = sphi %s2288_s19, %s3062_s19   ;;  %s2241_s18 = sphi %s2286_s18, %s3061_s18   ;;  %s2237_s17 = sphi %s2284_s17, %s3060_s17   ;;  %s2233_s16 = sphi %s2282_s16, %s3059_s16   ;;  %s2229_s15 = sphi %s2280_s15, %s3058_s15  }
   0x5   : > { %s29_s23 = sadd.s32 1, %s2245_s19  ;;  %s140_s24 = sadd.s32 1, %s2237_s17 }
   0x6   : > { %p31_p0 = scmp.ge.s32.totalorder %s29_s23, 2  ;;  %p150_p1 = scmp.ne.s32.totalorder %s2237_s17, %s2233_s16 }
   0x7   : > { %p151_p2 = scmp.eq.s32.totalorder %s1810_s21, 1  ;;  %p156_p3 = scmp.ne.s32.totalorder %s2233_s16, %s2229_s15 }
   0x8   : > { %s3064_s23 = smov (%p31_p0, %s29_s23), 0  ;;  %p157_p5 = scmp.eq.s32.totalorder %s1811_s22, 1 }
   0x9   : > { %p2320_p4 = por %p151_p2, %p150_p1  ;;  %s135_s26 = ssub.s32 %s2245_s19, %s3064_s23 }
   0xa   : > { %p1814_p6 = scmp.ge.s32.totalorder %s2249_s20, 1  ;;  %p138_p7 = scmp.eq.s32.totalorder %s135_s26, 0 }
   0xb   : > { %p2327_p8 = por %p157_p5, %p156_p3  ;;  %p223_p9 = scmp.lt.s32.totalorder %s2249_s20, 3 }
   0xc   : > { %s2333_s28 = scalar_select %p138_p7, %s2237_s17, %s140_s24  }
   0xd   : > { %p224_p10 = pnand %p1814_p6, %p223_p9 }
   0xe   : > { %p278_p11 = scmp.lt.s32.totalorder (!%p224_p10), %s2241_s18, 1  ;;  %v2117_v0 = vld [vmem:[%s3048_s2 + $0x40] sm:$0xff] (!%p224_p10)   ;;  %v2119_v2 = vld [vmem:[%s3048_s2 + $0x48] sm:$0xff] (!%p224_p10)   ;;  %v2123_v13 = vld [vmem:[%s3048_s2 + $0x50] sm:$0xff] (!%p224_p10)   ;;  %s2251_s7 = smov (!%p224_p10), 64   ;;  %vm969_vm0 = vcmask (!%p224_p10), 523264  }
   0xf   : > { %227 = sbr.rel (%p224_p10) target bundleno = 552 (0x228), region = 36  ;;  %v2118_v1 = vld [vmem:[%s3048_s2] sm:$0xff] (!%p224_p10)   ;;  %1928 = vmatprep.subr.bf16.mxu0 (!%p224_p10), %v2117_v0  ;;  %v2120_v3 = vld [vmem:[%s3048_s2 + $0x8] sm:$0xff] (!%p224_p10)   ;;  %v2124_v29 = vld [vmem:[%s3048_s2 + $0x10] sm:$0xff] (!%p224_p10)   ;;  %vm383_vm1 = vsmask.f32 (!%p224_p10), 3328 }
  0x10   : > { %1929 = vmatpush3.bf16.msra.mxu0 (!%p224_p10), %v2118_v1  ;;  %v2121_v4 = vld [vmem:[%s3048_s2 + $0xc0] sm:$0xff] (!%p224_p10)   ;;  %v2125_v33 = vld [vmem:[%s3048_s2 + $0xc8] sm:$0xff] (!%p224_p10)   ;;  %v2127_v41 = vld [vmem:[%s3048_s2 + $0x58] sm:$0xff] (!%p224_p10)   ;;  %vm384_vm2 = vsmask.f32 (!%p224_p10), 7440  ;;  %vm733_vm4 = vcmask (!%p224_p10), 519168  }
  0x11   : > { %1930 = vmatprep.subr.bf16.mxu0 (!%p224_p10), %v2119_v2  ;;  %v2122_v5 = vld [vmem:[%s3048_s2 + $0x80] sm:$0xff] (!%p224_p10)   ;;  %1968 = vmatprep.subr.bf16.mxu1 (!%p224_p10), %v2121_v4  ;;  %v2126_v39 = vld [vmem:[%s3048_s2 + $0x88] sm:$0xff] (!%p224_p10)   ;;  %v2128_v46 = vld [vmem:[%s3048_s2 + $0x18] sm:$0xff] (!%p224_p10)   ;;  %vm1679_vm5 = vcmask (!%p224_p10), 1043968   ;;  %vm1680_vm6 = vcmask (!%p224_p10), 261124  }
  0x12   : > { %1969 = vmatpush3.bf16.msra.mxu1 (!%p224_p10), %v2122_v5  ;;  %v2129_v49 = vld [vmem:[%s3048_s2 + $0xd0] sm:$0xff] (!%p224_p10)   ;;  %v2131_v55 = vld [vmem:[%s3048_s2 + $0x60] sm:$0xff] (!%p224_p10)   ;;  %v2133_v61 = vld [vmem:[%s3048_s2 + $0xd8] sm:$0xff] (!%p224_p10)  }
  0x13   : > { %1970 = vmatprep.subr.bf16.mxu1 (!%p224_p10), %v2125_v33  ;;  %v2130_v52 = vld [vmem:[%s3048_s2 + $0x90] sm:$0xff] (!%p224_p10)   ;;  %v2132_v57 = vld [vmem:[%s3048_s2 + $0x20] sm:$0xff] (!%p224_p10)   ;;  %v2134_v1 = vld [vmem:[%s3048_s2 + $0x98] sm:$0xff] (!%p224_p10)  }
  0x14   : > { %1931 = vmatpush3.bf16.msra.mxu0 (!%p224_p10), %v2120_v3  ;;  %v2135_v4 = vld [vmem:[%s3048_s2 + $0x68] sm:$0xff] (!%p224_p10)   ;;  %vm2740_vm3 = vmor (!%p224_p10), %vm383_vm1, %vm384_vm2 }
  0x15   : > { %1932 = vmatprep.subr.bf16.mxu0 (!%p224_p10), %v2123_v13  ;;  %vm2953_vm7 = vmor (!%p224_p10), %vm1680_vm6, %vm1679_vm5 }
  0x16   : > { %s2340_s5 = scalar_select %p278_p11, %s2241_s18, 1  ;;  %1971 = vmatpush3.bf16.msra.mxu1 %v2126_v39  ;;  %v2146_v39 = vld [vmem:[%s3048_s2 + $0xb0] sm:$0xff]  }
  0x17   : > { %1972 = vmatprep.subr.bf16.mxu1 %v2129_v49 }
  0x18   : > { %s2040_s10 = smul.u32 144, %s2340_s5  ;;  %1933 = vmatpush3.bf16.msra.mxu0 %v2124_v29  ;;  %v2142_v29 = vld [vmem:[%s3048_s2 + $0xa8] sm:$0xff]  }
  0x19   : > { %1934 = vmatprep.subr.bf16.mxu0 %v2127_v41 }
  0x1a   : > { %s2360_s24 = scalar_lea.vmem %s3046_s0, %s2040_s10  ;;  %1973 = vmatpush3.bf16.msra.mxu1 %v2130_v52  ;;  %s1918_s13 = sadd.s32 128, %s2040_s10 }
  0x1b   : > { %v2366_v6 = vld [vmem:[%s2360_s24 + $0x8] sm:$0xf]  ;;  %v2369_v7 = vld [vmem:[%s2360_s24 + $0x18] sm:$0xf]  ;;  %v2372_v8 = vld [vmem:[%s2360_s24 + $0xc] sm:$0x1]  ;;  %1974 = vmatprep.subr.bf16.mxu1 %v2133_v61  ;;  %s2600_s22 = scalar_lea.vmem %s3047_s1, %s1918_s13 }
  0x1c   : > { %v1826_v9 = vcombine.low %v2366_v6, %v2366_v6  ;;  %v1834_v10 = vcombine.low %v2366_v6, %v2372_v8  ;;  %v2379_v11 = vld [vmem:[%s2360_s24 + $0x1c] sm:$0x1]  ;;  %v2382_v12 = vld [vmem:[%s2360_s24 + $0x28] sm:$0xf]  ;;  %v2390_v15 = vld [vmem:[%s2360_s24 + $0x38] sm:$0xf]  ;;  %v1827_v18 = vcombine.low %v2369_v7, %v2369_v7  ;;  %1935 = vmatpush3.bf16.msra.mxu0 %v2128_v46 }
  0x1d   : > { %v1835_v14 = vcombine.low %v2369_v7, %v2379_v11  ;;  %v2393_v16 = vld [vmem:[%s2360_s24 + $0x2c] sm:$0x1]  ;;  %v2396_v17 = vld [vmem:[%s2360_s24 + $0x3c] sm:$0x1]  ;;  %v2406_v24 = vld [vmem:[%s2360_s24 + $0x48] sm:$0xf]  ;;  %v1828_v31 = vcombine.low %v2382_v12, %v2382_v12  ;;  %v1829_v53 = vcombine.low %v2390_v15, %v2390_v15  ;;  %1936 = vmatprep.subr.bf16.mxu0 %v2131_v55 }
  0x1e   : > { %846 = vrot.lane.b32.xlu0 %v1826_v9, %s2251_s7  ;;  %v887_v19 = vshrl.u32 %v1834_v10, 16  ;;  %v889_v20 = vshll.u32 %v1834_v10, 16  ;;  %v1836_v21 = vcombine.low %v2382_v12, %v2393_v16  ;;  %v1837_v23 = vcombine.low %v2390_v15, %v2396_v17  ;;  %v328_v25 = vld [vmem:[%s2360_s24 + $0x4c] sm:$0x1]  ;;  %v2415_v32 = vld [vmem:[%s2360_s24 + $0x58] sm:$0xf]  ;;  %1975 = vmatpush3.bf16.msra.mxu1 %v2134_v1 }
  0x1f   : > { %v896_v22 = vshll.u32 %v1835_v14, 16  ;;  %v894_v27 = vshrl.u32 %v1835_v14, 16  ;;  %v1838_v37 = vcombine.low %v2406_v24, %v328_v25  ;;  %v2423_v38 = vld [vmem:[%s2360_s24 + $0x5c] sm:$0x1]  ;;  %v2435_v45 = vld [vmem:[%s2360_s24 + $0x68] sm:$0xf]  ;;  %v1830_v58 = vcombine.low %v2406_v24, %v2406_v24 }
  0x20   : > { %v891_v26 = vrot.slane %v889_v20, 1  ;;  %v903_v28 = vshll.u32 %v1836_v21, 16  ;;  %v901_v35 = vshrl.u32 %v1836_v21, 16  ;;  %v910_v40 = vshll.u32 %v1837_v23, 16  ;;  %v2445_v51 = vld [vmem:[%s2360_s24 + $0x6c] sm:$0x1]  ;;  %1937 = vmatpush3.bf16.msra.mxu0 %v2132_v57 }
  0x21   : > { %v898_v30 = vrot.slane %v896_v22, 1  ;;  %v908_v43 = vshrl.u32 %v1837_v23, 16  ;;  %v1839_v44 = vcombine.low %v2415_v32, %v2423_v38  ;;  %v917_v48 = vshll.u32 %v1838_v37, 16  ;;  %v2468_v62 = vld [vmem:[%s2360_s24 + $0x78] sm:$0xf]  ;;  %v2136_v9 = vld [vmem:[%s3048_s2 + $0x28] sm:$0xff]   ;;  %1938 = vmatprep.subr.bf16.mxu0 %v2135_v4 }
  0x22   : > { %848 = vrot.lane.b32.xlu0 %v1827_v18, %s2251_s7  ;;  %v892_v34 = vor.u32 %v891_v26, %v887_v19  ;;  %v905_v36 = vrot.slane %v903_v28, 1  ;;  %v912_v50 = vrot.slane %v910_v40, 1  ;;  %v915_v54 = vshrl.u32 %v1838_v37, 16  ;;  %v2471_v63 = vld [vmem:[%s2360_s24 + $0x7c] sm:$0x1]  ;;  %v2137_v18 = vld [vmem:[%s3048_s2 + $0xe0] sm:$0xff]  }
  0x23   : > { %v899_v42 = vor.u32 %v898_v30, %v894_v27  ;;  %v924_v56 = vshll.u32 %v1839_v44, 16  ;;  %v919_v59 = vrot.slane %v917_v48, 1  ;;  %v1840_v60 = vcombine.low %v2435_v45, %v2445_v51  ;;  %v2138_v20 = vld [vmem:[%s3048_s2 + $0xa0] sm:$0xff]   ;;  %1976 = vmatprep.subr.bf16.mxu1 %v2137_v18  ;;  %v2139_v23 = vld [vmem:[%s3048_s2 + $0x70] sm:$0xff]   ;;  %v2141_v28 = vld [vmem:[%s3048_s2 + $0xe8] sm:$0xff]   ;;  %s2252_s10 = smov [#allocation2]  }
  0x24   : > { %942 = vrot.lane.b32.xlu1 %v892_v34, %s2251_s7  ;;  %v906_v47 = vor.u32 %v905_v36, %v901_v35  ;;  %v913_v0 = vor.u32 %v912_v50, %v908_v43  ;;  %v922_v5 = vshrl.u32 %v1839_v44, 16  ;;  %v1831_v10 = vcombine.low %v2415_v32, %v2415_v32  ;;  %1939 = vmatpush3.bf16.msra.mxu0 %v2136_v9  ;;  %v2140_v25 = vld [vmem:[%s3048_s2 + $0x30] sm:$0xff]   ;;  %v2144_v34 = vld [vmem:[%s3048_s2 + $0x38] sm:$0xff]   ;;  %v2529_v40 = vld [vmem:[%s2360_s24] sm:$0xf]  ;;  %s2175_s26 = sshll.u32 %s2252_s10, 4  ;;  %s2176_s26 = int_to_ptr.vmem [resolvable:$false] %s2175_s26 }
  0x25   : > { %v920_v2 = vor.u32 %v919_v59, %v915_v54  ;;  %v931_v3 = vshll.u32 %v1840_v60, 16  ;;  %v926_v13 = vrot.slane %v924_v56, 1  ;;  %v1841_v14 = vcombine.low %v2468_v62, %v2471_v63  ;;  %1977 = vmatpush3.bf16.msra.mxu1 %v2138_v20  ;;  %1940 = vmatprep.subr.bf16.mxu0 %v2139_v23  ;;  %v2145_v37 = vld [vmem:[%s3048_s2 + $0xf0] sm:$0xff]   ;;  %v2150_v43 = vld [vmem:[%s3048_s2 + $0xf8] sm:$0xff]   ;;  %v2541_v44 = vld [vmem:[%s3048_s2 + $0x100] sm:$0xff]   ;;  %s2177_s29 = scalar_lea.vmem %s2176_s26, 2048 }
  0x26   : > { %850 = vrot.lane.b32.xlu0 %v1828_v31, %s2251_s7  ;;  %v929_v19 = vshrl.u32 %v1840_v60, 16  ;;  %v1832_v21 = vcombine.low %v2435_v45, %v2435_v45  ;;  %1978 = vmatprep.subr.bf16.mxu1 %v2141_v28  ;;  %v2143_v31 = vld [vmem:[%s3048_s2 + $0x78] sm:$0xff]   ;;  %v1833_v35 = vcombine.low %v2468_v62, %v2468_v62  ;;  %v2532_v41 = vld [vmem:[%s2360_s24 + $0x10] sm:$0xf]  ;;  %v2544_v46 = vld [vmem:[%s2360_s24 + $0x20] sm:$0xf] }
  0x27   : > { %v933_v22 = vrot.slane %v931_v3, 1  ;;  %v927_v26 = vor.u32 %v926_v13, %v922_v5  ;;  %v938_v27 = vshll.u32 %v1841_v14, 16  ;;  %v936_v33 = vshrl.u32 %v1841_v14, 16  ;;  %v2561_v49 = vld [vmem:[%s2360_s24 + $0x40] sm:$0xf] }
  0x28   : > { %944 = vrot.lane.b32.xlu1 %v899_v42, %s2251_s7  ;;  %1941 = vmatpush3.bf16.msra.mxu0 %v2140_v25  ;;  %v1847_v48 = vcombine.low %v2532_v41, %v2544_v46  ;;  %v2566_v50 = vld [vmem:[%s2360_s24 + $0x30] sm:$0xf]  ;;  %v2571_v52 = vld [vmem:[%s2360_s24 + $0x60] sm:$0xf]  ;;  %v2614_v56 = vld [vmem:[%s2360_s24 + $0x4] sm:$0x1]  ;;  %v1844_v23 = vcombine.low %v2529_v40, %v2532_v41 }
  0x29   : > { %v934_v30 = vor.u32 %v933_v22, %v929_v19  ;;  %1979 = vmatpush3.bf16.msra.mxu1 %v2142_v29  ;;  %v940_v36 = vrot.slane %v938_v27, 1  ;;  %1942 = vmatprep.subr.bf16.mxu0 %v2143_v31  ;;  %v2583_v54 = vld [vmem:[%s2360_s24 + $0x70] sm:$0xf]  ;;  %v2607_v55 = vld [vmem:[%s2600_s22] sm:$0xf] }
  0x2a   : > { %946 = vrot.lane.b32.xlu0 %v906_v47, %s2251_s7  ;;  %1980 = vmatprep.subr.bf16.mxu1 %v2145_v37  ;;  %v2153_v47 = vld [vmem:[%s3048_s2 + $0xb8] sm:$0xff]   ;;  %v2617_v57 = vld [vmem:[%s2360_s24 + $0x14] sm:$0x1]  ;;  %v2636_v20 = vld [vmem:[%s2360_s24 + $0x44] sm:$0x1] }
  0x2b   : > { %v941_v42 = vor.u32 %v940_v36, %v936_v33  ;;  %1508 = vmatprep.mubr.bf16.mxu1 %v1847_v48  ;;  %v1819_v59 = vcombine.low %v2532_v41, %v2617_v57  ;;  %v2157_v36 = vld [vmem:[%s3048_s2 + $0x108] sm:$0xff]   ;;  %v1852_v48 = vcombine.low %v2566_v50, %v2561_v49 }
  0x2c   : > { %852 = vrot.lane.b32.xlu1 %v1829_v53, %s2251_s7  ;;  %1943 = vmatpush3.bf16.msra.mxu0 %v2144_v34  ;;  %v2576_v53 = vld [vmem:[%s2360_s24 + $0x50] sm:$0xf] }
  0x2d   : > { %1981 = vmatpush3.bf16.msra.mxu1 %v2146_v39  ;;  %2016 = vmatprep.subr.bf16.mxu0 %v2541_v44  ;;  %v784_v61 = vshll.u32 %v1819_v59, 16  ;;  %v782_v4 = vshrl.u32 %v1819_v59, 16 }
  0x2e   : > { %854 = vrot.lane.b32.xlu0 %v1830_v58, %s2251_s7  ;;  %1982 = vmatprep.subr.bf16.mxu1 %v2150_v43  ;;  %v1818_v58 = vcombine.low %v2529_v40, %v2614_v56 }
  0x2f   : > { %v786_v5 = vrot.slane %v784_v61, 1 }
  0x30   : > { %948 = vrot.lane.b32.xlu1 %v913_v0, %s2251_s7  ;;  %v777_v60 = vshll.u32 %v1818_v58, 16  ;;  %v2624_v0 = vld [vmem:[%s2360_s24 + $0x24] sm:$0x1]  ;;  %v775_v1 = vshrl.u32 %v1818_v58, 16 }
  0x31   : > { %1983 = vmatpush3.bf16.msra.mxu1 %v2153_v47  ;;  %v1820_v9 = vcombine.low %v2544_v46, %v2624_v0  ;;  %v2633_v18 = vor.u32 %v786_v5, %v782_v4  ;;  %v2659_v58 = vld [vmem:[%s2360_s24 + $0x64] sm:$0x1]  ;;  %v2162_v5 = vld [vmem:[%s3048_s2 + $0x110] sm:$0xff]  }
  0x32   : > { %950 = vrot.lane.b32.xlu0 %v920_v2, %s2251_s7  ;;  %2032 = vmatprep.subr.bf16.mxu1 %v2541_v44  ;;  %v2627_v2 = vld [vmem:[%s2360_s24 + $0x34] sm:$0x1]  ;;  %v779_v3 = vrot.slane %v777_v60, 1 }
  0x33   : > { %v791_v19 = vshll.u32 %v1820_v9, 16  ;;  %v789_v25 = vshrl.u32 %v1820_v9, 16  ;;  %v2669_v9 = vld [vmem:[%s2360_s24 + $0x74] sm:$0x1] }
  0x34   : > { %856 = vrot.lane.b32.xlu1 %v1831_v10, %s2251_s7  ;;  %v1821_v10 = vcombine.low %v2566_v50, %v2627_v2  ;;  %v780_v14 = vor.u32 %v779_v3, %v775_v1 }
  0x35   : > { %v793_v29 = vrot.slane %v791_v19, 1 }
  0x36   : > { %858 = vrot.lane.b32.xlu0 %v1832_v21, %s2251_s7  ;;  %v798_v21 = vshll.u32 %v1821_v10, 16  ;;  %v796_v34 = vshrl.u32 %v1821_v10, 16 }
  0x38   : > { %952 = vrot.lane.b32.xlu1 %v927_v26, %s2251_s7  ;;  %v2641_v26 = vld [vmem:[%s2360_s24 + $0x54] sm:$0x1] }
  0x39   : > { %v1823_v37 = vcombine.low %v2576_v53, %v2641_v26 }
  0x3a   : > { %954 = vrot.lane.b32.xlu0 %v934_v30, %s2251_s7  ;;  %v1822_v30 = vcombine.low %v2561_v49, %v2636_v20 }
  0x3b   : > { %v812_v1 = vshll.u32 %v1823_v37, 16 }
  0x3c   : > { %860 = vrot.lane.b32.xlu1 %v1833_v35, %s2251_s7  ;;  %v800_v35 = vrot.slane %v798_v21, 1  ;;  %v805_v43 = vshll.u32 %v1822_v30, 16 }
  0x3e   : > { %351 = vrot.lane.b32.xlu0 %v2529_v40, %s2251_s7  ;;  %v2663_v61 = vor.u32 %v800_v35, %v796_v34  ;;  %v807_v19 = vrot.slane %v805_v43, 1 }
  0x40   : > { %956 = vrot.lane.b32.xlu1 %v941_v42, %s2251_s7  ;;  %v2653_v42 = vor.u32 %v793_v29, %v789_v25  ;;  %v810_v25 = vshrl.u32 %v1823_v37, 16 }
  0x42   : > { %355 = vrot.lane.b32.xlu0 %v2544_v46, %s2251_s7 }
  0x44   : > { %353 = vrot.lane.b32.xlu1 %v2532_v41, %s2251_s7 }
  0x46   : > { %359 = vrot.lane.b32.xlu0 %v2561_v49, %s2251_s7 }
  0x48   : > { %357 = vrot.lane.b32.xlu1 %v2566_v50, %s2251_s7 }
  0x4a   : > { %363 = vrot.lane.b32.xlu0 %v2571_v52, %s2251_s7 }
  0x4c   : > { %361 = vrot.lane.b32.xlu1 %v2576_v53, %s2251_s7 }
  0x4e   : > { %530 = vrot.lane.b32.xlu0 %v2366_v6, %s2251_s7 }
  0x50   : > { %365 = vrot.lane.b32.xlu1 %v2583_v54, %s2251_s7 }
  0x52   : > { %534 = vrot.lane.b32.xlu0 %v2382_v12, %s2251_s7 }
  0x54   : > { %532 = vrot.lane.b32.xlu1 %v2369_v7, %s2251_s7 }
  0x56   : > { %538 = vrot.lane.b32.xlu0 %v2406_v24, %s2251_s7 }
  0x58   : > { %536 = vrot.lane.b32.xlu1 %v2390_v15, %s2251_s7 }
  0x5a   : > { %542 = vrot.lane.b32.xlu0 %v2435_v45, %s2251_s7 }
  0x5c   : > { %540 = vrot.lane.b32.xlu1 %v2415_v32, %s2251_s7 }
  0x5e   : > { %699 = vrot.lane.b32.xlu0 %v2607_v55, %s2251_s7 }
  0x60   : > { %544 = vrot.lane.b32.xlu1 %v2468_v62, %s2251_s7 }
  0x90   : > { %v847_v13 = vpop.permute.xlu0 %846 }
  0x91   : > { %v972_v27 = vsel %vm969_vm0, %v780_v14, %v847_v13  ;;  %v803_v14 = vshrl.u32 %v1822_v30, 16 }
  0x94   : > { %v849_v22 = vpop.permute.xlu0 %848 }
  0x95   : > { %v975_v28 = vsel %vm969_vm0, %v2633_v18, %v849_v22 }
  0x96   : > { %v943_v31 = vpop.permute.xlu1 %942  ;;  %v1845_v33 = vcombine.low %v972_v27, %v975_v28  ;;  %v814_v27 = vrot.slane %v812_v1, 1  ;;  %v1825_v28 = vcombine.low %v2583_v54, %v2669_v9 }
  0x97   : > { %v995_v59 = vsel %vm969_vm0, %v847_v13, %v943_v31  ;;  %v1824_v13 = vcombine.low %v2571_v52, %v2659_v58  ;;  %v2167_v31 = vld [vmem:[%s3048_s2 + $0x118] sm:$0xff]  }
  0x98   : > { %1443 = vmatprep.mubr.bf16.mxu0 %v1845_v33  ;;  %v851_v39 = vpop.permute.xlu0 %850  ;;  %v2685_v33 = vor.u32 %v807_v19, %v803_v14  ;;  %v824_v19 = vshrl.u32 %v1825_v28, 16 }
  0x99   : > { %1444 = vmatmul.mubr.bf16.vlgmr.msra.gmra.mrb[0].mxu0 %v1844_v23  ;;  %v978_v10 = vsel %vm969_vm0, %v2653_v42, %v851_v39  ;;  %v819_v34 = vshll.u32 %v1824_v13, 16 }
  0x9a   : > { %v945_v47 = vpop.permute.xlu1 %944  ;;  %2017 = vmatpush3.bf16.msra.mxu0 %v2541_v44 }
  0x9b   : > { %v997_v60 = vsel %vm969_vm0, %v849_v22, %v945_v47  ;;  %2018 = vmatprep.subr.bf16.mxu0 %v2157_v36  ;;  %v1849_v22 = vcombine.low %v2544_v46, %v2566_v50  ;;  %v815_v47 = vor.u32 %v814_v27, %v810_v25 }
  0x9c   : > { %v1846_v3 = vcombine.low %v995_v59, %v997_v60  ;;  %v947_v4 = vpop.permute.xlu0 %946 }
  0x9d   : > { %v999_v37 = vsel %vm969_vm0, %v851_v39, %v947_v4  ;;  %v1854_v4 = vcombine.low %v2561_v49, %v2576_v53 }
  0x9e   : > { %v853_v21 = vpop.permute.xlu1 %852  ;;  %1509 = vmatmul.mubr.bf16.vlgmr.msra.gmra.mrb[0].mxu1 %v1846_v3  ;;  %2019 = vmatpush3.bf16.msra.mxu0 %v2157_v36  ;;  %v817_v3 = vshrl.u32 %v1824_v13, 16 }
  0x9f   : > { %v981_v23 = vsel %vm969_vm0, %v2663_v61, %v853_v21  ;;  %2036 = vmatpush3.bf16.msra.mxu1 %v2541_v44  ;;  %1516 = vmatprep.mubr.bf16.mxu1 %v1852_v48  ;;  %v1857_v44 = vcombine.low %v2576_v53, %v2571_v52  ;;  %v826_v48 = vshll.u32 %v1825_v28, 16 }
  0xa0   : > { %v1850_v29 = vcombine.low %v978_v10, %v981_v23  ;;  %v855_v30 = vpop.permute.xlu0 %854  ;;  %2033 = vmatprep.subr.bf16.mxu1 %v2157_v36  ;;  %2020 = vmatprep.subr.bf16.mxu0 %v2162_v5  ;;  %v821_v10 = vrot.slane %v819_v34, 1 }
  0xa1   : > { %v984_v1 = vsel %vm969_vm0, %v2685_v33, %v855_v30 }
  0xa2   : > { %v949_v35 = vpop.permute.xlu1 %948  ;;  %1451 = vmatprep.mubr.bf16.mxu0 %v1850_v29  ;;  %2021 = vmatpush3.bf16.msra.mxu0 %v2162_v5  ;;  %v822_v23 = vor.u32 %v821_v10, %v817_v3  ;;  %v1862_v29 = vcombine.low %v2583_v54, %v2607_v55 }
  0xa3   : > { %v1001_v43 = vsel %vm969_vm0, %v853_v21, %v949_v35  ;;  %1452 = vmatmul.mubr.bf16.gmra.mrb[4].mxu0 %v1849_v22  ;;  %2037 = vmatpush3.bf16.msra.mxu1 %v2157_v36  ;;  %v2697_v36 = vld [vmem:[%s2600_s22 + $0x4] sm:$0x1]  ;;  %v828_v21 = vrot.slane %v826_v48, 1 }
  0xa4   : > { %v1851_v59 = vcombine.low %v999_v37, %v1001_v43  ;;  %v951_v60 = vpop.permute.xlu0 %950  ;;  %2034 = vmatprep.subr.bf16.mxu1 %v2162_v5  ;;  %2022 = vmatprep.subr.bf16.mxu0 %v2167_v31  ;;  %v1842_v27 = vcombine.low %v2607_v55, %v2697_v36 }
  0xa5   : > { %v1003_v34 = vsel %vm969_vm0, %v855_v30, %v951_v60  ;;  %v829_v28 = vor.u32 %v828_v21, %v824_v19  ;;  %v1848_v30 = vcombine.low %v2633_v18, %v2653_v42  ;;  %v577_v42 = vshrl.u32 %v2369_v7, 16 }
  0xa6   : > { %v857_v14 = vpop.permute.xlu1 %856  ;;  %1517 = vmatmul.mubr.bf16.gmra.mrb[4].mxu1 %v1851_v59  ;;  %2023 = vmatpush3.bf16.msra.mxu0 %v2167_v31  ;;  %v965_v37 = vshll.u32 %v1842_v27, 16  ;;  %v1859_v59 = vcombine.low %v2571_v52, %v2583_v54  ;;  %v963_v60 = vshrl.u32 %v1842_v27, 16  ;;  %v396_v27 = vshll.u32 %v2614_v56, 16 }
  0xa7   : > { %v987_v39 = vsel %vm969_vm0, %v815_v47, %v857_v14  ;;  %1524 = vmatprep.mubr.bf16.mxu1 %v1857_v44  ;;  %2038 = vmatpush3.bf16.msra.mxu1 %v2162_v5 }
  0xa8   : > { %v1855_v22 = vcombine.low %v984_v1, %v987_v39  ;;  %2035 = vmatprep.subr.bf16.mxu1 %v2167_v31  ;;  %v859_v13 = vpop.permute.xlu0 %858  ;;  %v967_v10 = vrot.slane %v965_v37, 1  ;;  %v398_v37 = vrot.slane %v396_v27, 5  ;;  %v457_v27 = vshrl.u32 %v2576_v53, 16 }
  0xa9   : > { %v990_v44 = vsel %vm969_vm0, %v822_v23, %v859_v13 }
  0xaa   : > { %v953_v25 = vpop.permute.xlu1 %952  ;;  %1459 = vmatprep.mubr.bf16.mxu0 %v1855_v22  ;;  %v968_v21 = vor.u32 %v967_v10, %v963_v60  ;;  %v1853_v22 = vcombine.low %v2663_v61, %v2685_v33  ;;  %v410_v61 = vshll.u32 %v2617_v57, 16 }
  0xab   : > { %v1005_v35 = vsel %vm969_vm0, %v857_v14, %v953_v25  ;;  %1460 = vmatmul.mubr.bf16.gmra.mrb[8].mxu0 %v1854_v4  ;;  %2039 = vmatpush3.bf16.msra.mxu1 %v2167_v31  ;;  %v1858_v4 = vcombine.low %v815_v47, %v822_v23  ;;  %v401_v47 = vshrl.u32 %v2532_v41, 16  ;;  %v404_v23 = vshll.u32 %v2532_v41, 16 }
  0xac   : > { %v1856_v5 = vcombine.low %v1003_v34, %v1005_v35  ;;  %v955_v3 = vpop.permute.xlu0 %954  ;;  %v1863_v18 = vcombine.low %v829_v28, %v968_v21 }
  0xad   : > { %v1007_v14 = vsel %vm969_vm0, %v859_v13, %v955_v3  ;;  %v403_v34 = vrot.slane %v401_v47, 4  ;;  %v406_v35 = vrot.slane %v404_v23, 5  ;;  %v438_v3 = vshll.u32 %v2627_v2, 16 }
  0xae   : > { %v861_v43 = vpop.permute.xlu1 %860  ;;  %1525 = vmatmul.mubr.bf16.gmra.mrb[8].mxu1 %v1856_v5  ;;  %v390_v5 = vshll.u32 %v2529_v40, 16 }
  0xaf   : > { %v993_v48 = vsel %vm969_vm0, %v829_v28, %v861_v43  ;;  %1532 = vmatprep.mubr.bf16.mxu1 %v1862_v29  ;;  %v387_v28 = vshrl.u32 %v2529_v40, 16  ;;  %v407_v57 = vor.u32 %v406_v35, %v403_v34  ;;  %v440_v2 = vrot.slane %v438_v3, 5 }
  0xb0   : > { %v1860_v1 = vcombine.low %v990_v44, %v993_v48  ;;  %v352_v13 = vpop.permute.xlu0 %351  ;;  %v412_v44 = vrot.slane %v410_v61, 5  ;;  %v432_v48 = vshll.u32 %v2566_v50, 16 }
  0xb1   : > { %v375_v29 = vmax.bf16 %v352_v13, %v2529_v40 }
  0xb2   : > { %v957_v31 = vpop.permute.xlu1 %956  ;;  %1467 = vmatprep.mubr.bf16.mxu0 %v1860_v1  ;;  %v392_v1 = vrot.slane %v390_v5, 5  ;;  %v434_v10 = vrot.slane %v432_v48, 5 }
  0xb3   : > { %v1009_v39 = vsel %vm969_vm0, %v861_v43, %v957_v31  ;;  %1468 = vmatmul.mubr.bf16.gmra.mrb[12].mxu0 %v1859_v59  ;;  %v429_v43 = vshrl.u32 %v2566_v50, 16  ;;  %v389_v59 = vrot.slane %v387_v28, 4 }
  0xb4   : > { %v1861_v19 = vcombine.low %v1007_v14, %v1009_v39  ;;  %2024 = vmatprep.mubr.msk.bf16.mxu0 %vm969_vm0, %v1848_v30  ;;  %v2736_v30 = vpop.permute.xlu0 %355  ;;  %v415_v14 = vshrl.u32 %v2544_v46, 16  ;;  %v408_v39 = vrot.slane %v407_v57, 4  ;;  %v459_v57 = vrot.slane %v457_v27, 4 }
  0xb5   : > { %v431_v40 = vrot.slane %v429_v43, 4  ;;  %v377_v47 = vmax.bf16 %v2736_v30, %v2544_v46  ;;  %v460_v43 = vshll.u32 %v2576_v53, 16 }
  0xb6   : > { %1533 = vmatmul.mubr.bf16.gmra.mrb[12].mxu1 %v1861_v19  ;;  %v2722_v25 = vpop.permute.xlu1 %353  ;;  %v418_v19 = vshll.u32 %v2544_v46, 16  ;;  %v2753_v23 = vsel %vm2740_vm3, %v408_v39, %v412_v44  ;;  %v466_v44 = vshll.u32 %v2641_v26, 16  ;;  %v443_v39 = vshrl.u32 %v2561_v49, 16 }
  0xb7   : > { %2028 = vmatprep.mubr.msk.bf16.mxu1 %vm969_vm0, %v1858_v4  ;;  %v376_v33 = vmax.bf16 %v2722_v25, %v2532_v41  ;;  %v393_v4 = vor.u32 %v392_v1, %v389_v59  ;;  %v435_v21 = vor.u32 %v434_v10, %v431_v40 }
  0xb8   : > { %v420_v61 = vrot.slane %v418_v19, 5  ;;  %v2763_v59 = vpop.permute.xlu0 %359 }
  0xb9   : > { %v394_v13 = vrot.slane %v393_v4, 4  ;;  %v507_v35 = vmax.bf16 %v2753_v23, %v376_v33  ;;  %v436_v28 = vrot.slane %v435_v21, 4  ;;  %v462_v33 = vrot.slane %v460_v43, 5 }
  0xba   : > { %v2734_v56 = vpop.permute.xlu1 %357  ;;  %v446_v4 = vshll.u32 %v2561_v49, 16 }
  0xbb   : > { %2025 = vmatmul.mubr.msk.bf16.vlgmr.msra.gmra.mrb[16].mxu0 %vm969_vm0, %v1853_v22  ;;  %v378_v31 = vmax.bf16 %v2734_v56, %v2566_v50  ;;  %v417_v22 = vrot.slane %v415_v14, 4  ;;  %v2769_v3 = vsel %vm2740_vm3, %v436_v28, %v440_v2  ;;  %v468_v14 = vrot.slane %v466_v44, 5 }
  0xbc   : > { %v463_v26 = vor.u32 %v462_v33, %v459_v57  ;;  %v379_v2 = vmax.bf16 %v2763_v59, %v2561_v49  ;;  %v448_v27 = vrot.slane %v446_v4, 5  ;;  %v474_v33 = vshll.u32 %v2571_v52, 16 }
  0xbd   : > { %v421_v48 = vor.u32 %v420_v61, %v417_v22  ;;  %v2774_v10 = vmax.bf16 %v2769_v3, %v378_v31  ;;  %v445_v31 = vrot.slane %v443_v39, 4  ;;  %v485_v22 = vshrl.u32 %v2583_v54, 16 }
  0xbe   : > { %2029 = vmatmul.mubr.msk.bf16.vlgmr.msra.gmra.mrb[16].mxu1 %vm969_vm0, %v1863_v18  ;;  %v424_v18 = vshll.u32 %v2624_v0, 16  ;;  %v2756_v34 = vpop.permute.xlu1 %361  ;;  %v399_v0 = vsel %vm2740_vm3, %v394_v13, %v398_v37  ;;  %v464_v61 = vrot.slane %v463_v26, 4 }
  0xbf   : > { %v2765_v1 = vmax.bf16 %v399_v0, %v375_v29  ;;  %v380_v40 = vmax.bf16 %v2756_v34, %v2576_v53  ;;  %v422_v37 = vrot.slane %v421_v48, 4  ;;  %v452_v29 = vshll.u32 %v2636_v20, 16 }
  0xc0   : > { %v426_v5 = vrot.slane %v424_v18, 5  ;;  %v488_v18 = vshll.u32 %v2583_v54, 16  ;;  %v487_v28 = vrot.slane %v485_v22, 4  ;;  %v494_v0 = vshll.u32 %v2669_v9, 16 }
  0xc1   : > { %v454_v20 = vrot.slane %v452_v29, 5  ;;  %v2799_v57 = vsel %vm2740_vm3, %v464_v61, %v468_v14  ;;  %v449_v44 = vor.u32 %v448_v27, %v445_v31  ;;  %v480_v9 = vshll.u32 %v2659_v58, 16 }
  0xc2   : > { %v2781_v19 = vpop.permute.xlu1 %365  ;;  %v2785_v21 = vsel %vm2740_vm3, %v422_v37, %v426_v5  ;;  %v490_v43 = vrot.slane %v488_v18, 5  ;;  %v2795_v5 = vpop.permute.xlu0 %363  ;;  %v2804_v37 = vmax.bf16 %v2799_v57, %v380_v40  ;;  %v496_v26 = vrot.slane %v494_v0, 5 }
  0xc3   : > { %v2790_v13 = vmax.bf16 %v2785_v21, %v377_v47  ;;  %v382_v48 = vmax.bf16 %v2781_v19, %v2583_v54  ;;  %v471_v47 = vshrl.u32 %v2571_v52, 16  ;;  %v450_v4 = vrot.slane %v449_v44, 4 }
  0xc4   : > { %v491_v39 = vor.u32 %v490_v43, %v487_v28  ;;  %v476_v22 = vrot.slane %v474_v33, 5  ;;  %v381_v18 = vmax.bf16 %v2795_v5, %v2571_v52  ;;  %v482_v31 = vrot.slane %v480_v9, 5 }
  0xc5   : > { %v473_v29 = vrot.slane %v471_v47, 4  ;;  %v515_v27 = vmax.bf16 %v507_v35, %v2369_v7  ;;  %v2813_v40 = vsel %vm2740_vm3, %v450_v4, %v454_v20  ;;  %v580_v58 = vshll.u32 %v2369_v7, 16 }
  0xc6   : > { %v533_v14 = vpop.permute.xlu1 %532  ;;  %v492_v61 = vrot.slane %v491_v39, 4  ;;  %v586_v43 = vshll.u32 %v2379_v11, 16  ;;  %v2818_v0 = vmax.bf16 %v2813_v40, %v379_v2  ;;  %v579_v47 = vrot.slane %v577_v42, 4  ;;  %v531_v33 = vpop.permute.xlu0 %530 }
  0xc7   : > { %v477_v28 = vor.u32 %v476_v22, %v473_v29  ;;  %v555_v35 = vmax.bf16 %v533_v14, %v515_v27  ;;  %v582_v9 = vrot.slane %v580_v58, 5  ;;  %v563_v7 = vshrl.u32 %v2366_v6, 16 }
  0xc8   : > { %v2822_v44 = vsel %vm2740_vm3, %v492_v61, %v496_v26  ;;  %v588_v4 = vrot.slane %v586_v43, 5  ;;  %v566_v11 = vshll.u32 %v2366_v6, 16  ;;  %v3055_v2 = vshll.u32 %v2372_v8, 16 }
  0xc9   : > { %v2825_v39 = vmax.bf16 %v2822_v44, %v382_v48  ;;  %v478_v20 = vrot.slane %v477_v28, 4  ;;  %v514_v26 = vmax.bf16 %v2765_v1, %v2366_v6  ;;  %v583_v22 = vor.u32 %v582_v9, %v579_v47 }
  0xca   : > { %v574_v29 = vrot.slane %v3055_v2, 5  ;;  %v517_v48 = vmax.bf16 %v2774_v10, %v2390_v15  ;;  %v605_v14 = vshrl.u32 %v2390_v15, 16  ;;  %v537_v61 = vpop.permute.xlu1 %536  ;;  %v565_v28 = vrot.slane %v563_v7, 4  ;;  %v535_v9 = vpop.permute.xlu0 %534 }
  0xcb   : > { %v2835_v42 = vsel %vm2740_vm3, %v478_v20, %v482_v31  ;;  %v568_v8 = vrot.slane %v566_v11, 5  ;;  %v554_v58 = vmax.bf16 %v531_v33, %v514_v26  ;;  %v584_v43 = vrot.slane %v583_v22, 4 }
  0xcc   : > { %v2841_v27 = vmax.bf16 %v2835_v42, %v381_v18  ;;  %v607_v2 = vrot.slane %v605_v14, 4  ;;  %v608_v6 = vshll.u32 %v2390_v15, 16  ;;  %v614_v1 = vshll.u32 %v2396_v17, 16 }
  0xcd   : > { %v569_v31 = vor.u32 %v568_v8, %v565_v28  ;;  %v557_v47 = vmax.bf16 %v537_v61, %v517_v48  ;;  %v516_v10 = vmax.bf16 %v2790_v13, %v2382_v12  ;;  %v591_v20 = vshrl.u32 %v2382_v12, 16 }
  0xce   : > { %v589_v18 = vsel %vm2740_vm3, %v584_v43, %v588_v4  ;;  %v610_v7 = vrot.slane %v608_v6, 5  ;;  %v616_v11 = vrot.slane %v614_v1, 5  ;;  %v594_v33 = vshll.u32 %v2382_v12, 16  ;;  %v541_v28 = vpop.permute.xlu1 %540 }
  0xcf   : > { %v683_v26 = vmax.bf16 %v589_v18, %v555_v35  ;;  %v570_v22 = vrot.slane %v569_v31, 4  ;;  %v593_v15 = vrot.slane %v591_v20, 4  ;;  %v600_v17 = vshll.u32 %v2393_v16, 16 }
  0xd0   : > { %v611_v14 = vor.u32 %v610_v7, %v607_v2  ;;  %v596_v48 = vrot.slane %v594_v33, 5  ;;  %v556_v61 = vmax.bf16 %v535_v9, %v516_v10  ;;  %v519_v13 = vmax.bf16 %v2804_v37, %v2415_v32 }
  0xd1   : > { %v691_v8 = vmax.bf16 %v683_v26, %v2544_v46  ;;  %v575_v4 = vsel %vm2740_vm3, %v570_v22, %v574_v29  ;;  %v602_v43 = vrot.slane %v600_v17, 5  ;;  %v633_v12 = vshrl.u32 %v2415_v32, 16  ;;  %v539_v46 = vpop.permute.xlu0 %538  ;;  %v2169_v26 = vld [vmem:[%s2360_s24 + $0x48] sm:$0xf] }
  0xd2   : > { %v682_v35 = vmax.bf16 %v575_v4, %v554_v58  ;;  %v612_v6 = vrot.slane %v611_v14, 4  ;;  %v597_v1 = vor.u32 %v596_v48, %v593_v15  ;;  %v636_v16 = vshll.u32 %v2415_v32, 16  ;;  %v2170_v14 = vld [vmem:[%s2360_s24 + $0x4c] sm:$0x1]  ;;  %s268_s24 = sand.u32 1, %s2233_s16  }
  0xd3   : > { %v2860_v2 = vmax.bf16 %v691_v8, %v2736_v30  ;;  %v635_v31 = vrot.slane %v633_v12, 4  ;;  %v642_v37 = vshll.u32 %v2423_v38, 16  ;;  %v559_v10 = vmax.bf16 %v541_v28, %v519_v13  ;;  %s1815_s8 = sshll.u32 %s268_s24, 6 }
  0xd4   : > { %v690_v20 = vmax.bf16 %v682_v35, %v2532_v41  ;;  %v617_v29 = vsel %vm2740_vm3, %v612_v6, %v616_v11  ;;  %v598_v58 = vrot.slane %v597_v1, 4  ;;  %v638_v9 = vrot.slane %v636_v16, 5  ;;  %s2912_s9 = scalar_lea.vmem [#allocation2], %s1815_s8 }
  0xd5   : > { %v726_v32 = vmax.bf16 %v2860_v2, %v2785_v21  ;;  %v685_v18 = vmax.bf16 %v617_v29, %v557_v47  ;;  %v644_v30 = vrot.slane %v642_v37, 5  ;;  %v518_v7 = vmax.bf16 %v2818_v0, %v2406_v24  ;;  %s1707_s13 = sshll.u32 %s2912_s9, 4  ;;  %s2989_s13 = int_to_ptr.vmem [resolvable:$true] %s1707_s13 }
  0xd6   : > { %v2871_v38 = vmax.bf16 %v690_v20, %v2722_v25  ;;  %v603_v41 = vsel %vm2740_vm3, %v598_v58, %v602_v43  ;;  %v639_v33 = vor.u32 %v638_v9, %v635_v31  ;;  %v619_v22 = vshrl.u32 %v2169_v26, 16  ;;  %v543_v43 = vpop.permute.xlu0 %542  ;;  %s2171_s5 = scalar_lea.vmem %s2989_s13, 1024  ;;  %p2178_p1 = scmp.lt.s32.totalorder %s2989_s13, %s2176_s26 }
  0xd7   : > { %v693_v11 = vmax.bf16 %v685_v18, %v2561_v49  ;;  %v684_v15 = vmax.bf16 %v603_v41, %v556_v61  ;;  %v622_v17 = vshll.u32 %v2169_v26, 16  ;;  %v628_v48 = vshll.u32 %v2170_v14, 16  ;;  %735 = vst.msk [vmem:[%s2912_s9 + $0x8] sm:$0xf] %vm733_vm4, %v726_v32  ;;  %p2172_p12 = scmp.ne.s32.totalorder %s2989_s13, %s2171_s5  ;;  %p2179_p2 = scmp.lt.s32.totalorder %s2177_s29, %s2171_s5 }
  0xd8   : > { %v725_v47 = vmax.bf16 %v2871_v38, %v2753_v23  ;;  %v640_v13 = vrot.slane %v639_v33, 4  ;;  %v621_v24 = vrot.slane %v619_v22, 4  ;;  %v558_v25 = vmax.bf16 %v539_v46, %v518_v7  ;;  %v545_v46 = vpop.permute.xlu1 %544 }
  0xd9   : > { %v705_v0 = vmax.bf16 %v693_v11, %v2763_v59  ;;  %v692_v28 = vmax.bf16 %v684_v15, %v2566_v50  ;;  %v624_v8 = vrot.slane %v622_v17, 5  ;;  %v630_v4 = vrot.slane %v628_v48, 5  ;;  %p2173_p13 = pnand %p2172_p12, %p2320_p4  ;;  %p2180_p3 = por %p2179_p2, %p2178_p1 }
  0xda   : > { %v645_v49 = vsel %vm2740_vm3, %v640_v13, %v644_v30  ;;  %v520_v61 = vmax.bf16 %v2841_v27, %v2435_v45  ;;  %v647_v12 = vshrl.u32 %v2435_v45, 16  ;;  %v650_v23 = vshll.u32 %v2435_v45, 16  ;;  %734 = vst.msk [vmem:[%s2912_s9] sm:$0xf] %vm733_vm4, %v725_v47  ;;  %v700_v13 = vpop.permute.xlu0 %699 }
  0xdb   : > { %v728_v35 = vmax.bf16 %v705_v0, %v2813_v40  ;;  %v704_v6 = vmax.bf16 %v692_v28, %v2734_v56  ;;  %v687_v59 = vmax.bf16 %v645_v49, %v559_v10  ;;  %v625_v50 = vor.u32 %v624_v8, %v621_v24  ;;  %p2174_p0 = pneg %p2173_p13 }
  0xdc   : > { %v649_v1 = vrot.slane %v647_v12, 4  ;;  %v652_v16 = vrot.slane %v650_v23, 5  ;;  %v656_v31 = vshll.u32 %v2445_v51, 16  ;;  %v560_v37 = vmax.bf16 %v543_v43, %v520_v61 }
  0xdd   : > { %v727_v27 = vmax.bf16 %v704_v6, %v2769_v3  ;;  %v695_v20 = vmax.bf16 %v687_v59, %v2571_v52  ;;  %v626_v29 = vrot.slane %v625_v50, 4  ;;  %v521_v45 = vmax.bf16 %v2825_v39, %v2468_v62  ;;  %737 = vst.msk [vmem:[%s2912_s9 + $0x18] sm:$0xf] %vm733_vm4, %v728_v35  ;;  %p2181_p5 = pnand %p2180_p3, %p2174_p0 }
  0xde   : > { %v653_v40 = vor.u32 %v652_v16, %v649_v1  ;;  %v658_v56 = vrot.slane %v656_v31, 5  ;;  %v661_v10 = vshrl.u32 %v2468_v62, 16  ;;  %v664_v58 = vshll.u32 %v2468_v62, 16 }
  0xdf   : > { %v707_v51 = vmax.bf16 %v695_v20, %v2795_v5  ;;  %v631_v9 = vsel %vm2740_vm3, %v626_v29, %v630_v4  ;;  %v670_v3 = vshll.u32 %v2471_v63, 16  ;;  %v561_v52 = vmax.bf16 %v545_v46, %v521_v45  ;;  %736 = vst.msk [vmem:[%s2912_s9 + $0x10] sm:$0xf] %vm733_vm4, %v727_v27 }
  0xe0   : > { %v686_v18 = vmax.bf16 %v631_v9, %v558_v25  ;;  %v654_v30 = vrot.slane %v653_v40, 4  ;;  %v663_v7 = vrot.slane %v661_v10, 4  ;;  %v666_v39 = vrot.slane %v664_v58, 5 }
  0xe1   : > { %v730_v38 = vmax.bf16 %v707_v51, %v2835_v42  ;;  %v672_v41 = vrot.slane %v670_v3, 5  ;;  %v711_v33 = vshrl.u32 %v2607_v55, 16  ;;  %v714_v62 = vshll.u32 %v2607_v55, 16 }
  0xe2   : > { %v694_v26 = vmax.bf16 %v686_v18, %v2576_v53  ;;  %v659_v5 = vsel %vm2740_vm3, %v654_v30, %v658_v56  ;;  %v667_v22 = vor.u32 %v666_v39, %v663_v7  ;;  %v720_v63 = vshll.u32 %v2697_v36, 16 }
  0xe3   : > { %v688_v11 = vmax.bf16 %v659_v5, %v560_v37  ;;  %v713_v15 = vrot.slane %v711_v33, 4  ;;  %v716_v17 = vrot.slane %v714_v62, 5  ;;  %739 = vst.msk [vmem:[%s2912_s9 + $0x28] sm:$0xf] %vm733_vm4, %v730_v38 }
  0xe4   : > { %v706_v14 = vmax.bf16 %v694_v26, %v2756_v34  ;;  %v668_v42 = vrot.slane %v667_v22, 4  ;;  %v722_v47 = vrot.slane %v720_v63, 5 }
  0xe5   : > { %v696_v53 = vmax.bf16 %v688_v11, %v2583_v54  ;;  %v717_v36 = vor.u32 %v716_v17, %v713_v15 }
  0xe6   : > { %v729_v34 = vmax.bf16 %v706_v14, %v2799_v57  ;;  %v673_v48 = vsel %vm2740_vm3, %v668_v42, %v672_v41 }
  0xe7   : > { %v708_v21 = vmax.bf16 %v696_v53, %v2781_v19  ;;  %v689_v2 = vmax.bf16 %v673_v48, %v561_v52  ;;  %v718_v32 = vrot.slane %v717_v36, 4 }
  0xe8   : > { %738 = vst.msk [vmem:[%s2912_s9 + $0x20] sm:$0xf] %vm733_vm4, %v729_v34 }
  0xe9   : > { %v731_v24 = vmax.bf16 %v708_v21, %v2822_v44  ;;  %v697_v25 = vmax.bf16 %v689_v2, %v2607_v55  ;;  %v723_v54 = vsel %vm2740_vm3, %v718_v32, %v722_v47  ;;  %v1843_v44 = vld [vmem:[%s3049_s3] ss:$0 sm:$0xff] }
  0xeb   : > { %v709_v0 = vmax.bf16 %v700_v13, %v697_v25  ;;  %740 = vst.msk [vmem:[%s2912_s9 + $0x30] sm:$0xf] %vm733_vm4, %v731_v24 }
  0xed   : > { %v732_v57 = vmax.bf16 %v723_v54, %v709_v0 }
  0xef   : > { %741 = vst.msk [vmem:[%s2912_s9 + $0x38] sm:$0xf] %vm733_vm4, %v732_v57 }
 0x16c   : > { %v1944_v28 = vpop.f32.mrb[0].mxu0 }
 0x16d   : > { %v1945_v19 = vpop.f32.mrb[1].mxu0 }
 0x16e   : > { %v1946_v8 = vadd.f32 %v1945_v19, %v1944_v28  ;;  %v1947_v4 = vpop.f32.mrb[2].mxu0 }
 0x16f   : > { %v1948_v43 = vpop.f32.mrb[3].mxu0 }
 0x170   : > { %v1949_v49 = vadd.f32 %v1948_v43, %v1947_v4  ;;  %v1446_v60 = vadd.f32 %v1946_v8, %v1843_v44 }
 0x171   : > { %v1984_v55 = vpop.f32.mrb[0].mxu1 }
 0x172   : > { %v1985_v61 = vpop.f32.mrb[1].mxu1  ;;  %v1449_v6 = vadd.f32 %v1949_v49, %v1843_v44 }
 0x173   : > { %v1986_v12 = vadd.f32 %v1985_v61, %v1984_v55  ;;  %v1987_v23 = vpop.f32.mrb[2].mxu1 }
 0x174   : > { %v1988_v35 = vpop.f32.mrb[3].mxu1 }
 0x175   : > { %v1989_v59 = vadd.f32 %v1988_v35, %v1987_v23  ;;  %v1511_v50 = vadd.f32 %v1986_v12, %v1446_v60 }
 0x176   : > { %v1950_v1 = vpop.f32.mrb[4].mxu0 }
 0x177   : > { %v1951_v16 = vpop.f32.mrb[5].mxu0  ;;  %v1514_v31 = vadd.f32 %v1989_v59, %v1449_v6 }
 0x178   : > { %v1952_v37 = vadd.f32 %v1951_v16, %v1950_v1  ;;  %v1953_v46 = vpop.f32.mrb[6].mxu0 }
 0x179   : > { %v1990_v27 = vpop.f32.mrb[4].mxu1  ;;  %v1954_v20 = vpop.f32.mrb[7].mxu0 }
 0x17a   : > { %v1454_v29 = vadd.f32 %v1952_v37, %v1843_v44  ;;  %v1955_v45 = vadd.f32 %v1954_v20, %v1953_v46  ;;  %v1991_v40 = vpop.f32.mrb[5].mxu1 }
 0x17b   : > { %v1992_v56 = vadd.f32 %v1991_v40, %v1990_v27  ;;  %v1993_v10 = vpop.f32.mrb[6].mxu1 }
 0x17c   : > { %v1457_v58 = vadd.f32 %v1955_v45, %v1843_v44  ;;  %v1994_v51 = vpop.f32.mrb[7].mxu1 }
 0x17d   : > { %v1995_v9 = vadd.f32 %v1994_v51, %v1993_v10  ;;  %v1519_v3 = vadd.f32 %v1992_v56, %v1454_v29 }
 0x17e   : > { %v1956_v52 = vpop.f32.mrb[8].mxu0 }
 0x17f   : > { %v1957_v18 = vpop.f32.mrb[9].mxu0  ;;  %v1522_v30 = vadd.f32 %v1995_v9, %v1457_v58 }
 0x180   : > { %v1958_v7 = vadd.f32 %v1957_v18, %v1956_v52  ;;  %v1959_v39 = vpop.f32.mrb[10].mxu0 }
 0x181   : > { %v1960_v38 = vpop.f32.mrb[11].mxu0  ;;  %v1996_v41 = vpop.f32.mrb[8].mxu1 }
 0x182   : > { %v1462_v33 = vadd.f32 %v1958_v7, %v1843_v44  ;;  %v1961_v62 = vadd.f32 %v1960_v38, %v1959_v39  ;;  %v1997_v26 = vpop.f32.mrb[9].mxu1 }
 0x183   : > { %v1998_v5 = vadd.f32 %v1997_v26, %v1996_v41  ;;  %v1999_v22 = vpop.f32.mrb[10].mxu1 }
 0x184   : > { %v1465_v63 = vadd.f32 %v1961_v62, %v1843_v44  ;;  %v2000_v11 = vpop.f32.mrb[11].mxu1 }
 0x185   : > { %v2001_v15 = vadd.f32 %v2000_v11, %v1999_v22  ;;  %v1527_v17 = vadd.f32 %v1998_v5, %v1462_v33 }
 0x186   : > { %v1962_v14 = vpop.f32.mrb[12].mxu0 }
 0x187   : > { %v1963_v42 = vpop.f32.mrb[13].mxu0  ;;  %v1530_v53 = vadd.f32 %v2001_v15, %v1465_v63 }
 0x188   : > { %v1964_v36 = vadd.f32 %v1963_v42, %v1962_v14  ;;  %v1965_v34 = vpop.f32.mrb[14].mxu0 }
 0x189   : > { %v1966_v48 = vpop.f32.mrb[15].mxu0  ;;  %v2002_v47 = vpop.f32.mrb[12].mxu1 }
 0x18a   : > { %v1470_v21 = vadd.f32 %v1964_v36, %v1843_v44  ;;  %v1967_v2 = vadd.f32 %v1966_v48, %v1965_v34  ;;  %v2003_v32 = vpop.f32.mrb[13].mxu1 }
 0x18b   : > { %v2004_v13 = vadd.f32 %v2003_v32, %v2002_v47  ;;  %v2005_v24 = vpop.f32.mrb[14].mxu1 }
 0x18c   : > { %v1473_v25 = vadd.f32 %v1967_v2, %v1843_v44  ;;  %v2006_v54 = vpop.f32.mrb[15].mxu1 }
 0x18d   : > { %v2007_v0 = vadd.f32 %v2006_v54, %v2005_v24  ;;  %v1535_v57 = vadd.f32 %v2004_v13, %v1470_v21 }
 0x18e   : > { %v2026_v28 = vpop.f32.mrb[16].mxu0 }
 0x18f   : > { %v1584_v19 = vadd.f32 %v2026_v28, %v1519_v3  ;;  %v1575_v8 = vpop.f32.mrb[17].mxu0  ;;  %v1538_v4 = vadd.f32 %v2007_v0, %v1473_v25 }
 0x190   : > { %v1576_v43 = vadd.f32 %v1575_v8, %v1511_v50  ;;  %v2027_v49 = vpop.f32.mrb[18].mxu0 }
 0x191   : > { %v1608_v55 = vmax.f32 %v1584_v19, 0.0  ;;  %v1587_v61 = vadd.f32 %v2027_v49, %v1522_v30  ;;  %v1578_v60 = vpop.f32.mrb[19].mxu0  ;;  %v2030_v12 = vpop.f32.mrb[16].mxu1 }
 0x192   : > { %v1579_v23 = vadd.f32 %v1578_v60, %v1514_v31  ;;  %v1600_v35 = vadd.f32 %v2030_v12, %v1535_v57  ;;  %v1591_v6 = vpop.f32.mrb[17].mxu1  ;;  %v1606_v1 = vmax.f32 %v1576_v43, 0.0 }
 0x193   : > { %v1921_v59 = vpack.c.bf16 %v1608_v55, %v1608_v55  ;;  %v1609_v16 = vmax.f32 %v1587_v61, 0.0  ;;  %v1592_v44 = vadd.f32 %v1591_v6, %v1527_v17  ;;  %v2031_v37 = vpop.f32.mrb[18].mxu1 }
 0x194   : > { %v1603_v46 = vadd.f32 %v2031_v37, %v1538_v4  ;;  %v1594_v27 = vpop.f32.mrb[19].mxu1  ;;  %v1607_v29 = vmax.f32 %v1579_v23, 0.0  ;;  %v1919_v50 = vpack.c.bf16 %v1606_v1, %v1606_v1  ;;  %v1612_v10 = vmax.f32 %v1600_v35, 0.0 }
 0x195   : > { %v1922_v20 = vpack.c.bf16 %v1609_v16, %v1609_v16  ;;  %v1595_v45 = vadd.f32 %v1594_v27, %v1530_v53  ;;  %1642 = vrot.lane.b32.xlu1 %v1921_v59, %s2251_s7  ;;  %v1610_v40 = vmax.f32 %v1592_v44, 0.0 }
 0x196   : > { %v1920_v56 = vpack.c.bf16 %v1607_v29, %v1607_v29  ;;  %v1613_v51 = vmax.f32 %v1603_v46, 0.0  ;;  %v1925_v3 = vpack.c.bf16 %v1612_v10, %v1612_v10 }
 0x197   : > { %1644 = vrot.lane.b32.xlu0 %v1922_v20, %s2251_s7  ;;  %v1611_v31 = vmax.f32 %v1595_v45, 0.0  ;;  %v1923_v58 = vpack.c.bf16 %v1610_v40, %v1610_v40 }
 0x198   : > { %v1926_v52 = vpack.c.bf16 %v1613_v51, %v1613_v51 }
 0x199   : > { %1638 = vrot.lane.b32.xlu1 %v1919_v50, %s2251_s7  ;;  %v1924_v9 = vpack.c.bf16 %v1611_v31, %v1611_v31 }
 0x19b   : > { %1640 = vrot.lane.b32.xlu0 %v1920_v56, %s2251_s7 }
 0x19d   : > { %1646 = vrot.lane.b32.xlu1 %v1923_v58, %s2251_s7 }
 0x19f   : > { %1648 = vrot.lane.b32.xlu0 %v1924_v9, %s2251_s7 }
 0x1a1   : > { %1650 = vrot.lane.b32.xlu1 %v1925_v3, %s2251_s7 }
 0x1a3   : > { %1652 = vrot.lane.b32.xlu0 %v1926_v52, %s2251_s7  ;;  %s1927_s7 = sshll.u32 %s2241_s18, 10  ;;  %s3000_s18 = scalar_lea.sflag [#allocation3], %s268_s24 }
 0x1a4   : > { %s2987_s22 = scalar_lea.hbm %s3050_s4, %s1927_s7 }
 0x207   : > { %v1643_v18 = vpop.permute.xlu1 %1642 }
 0x208   : > { %v1656_v7 = vrot.slane %v1643_v18, 4 }
 0x209   : > { %v1645_v39 = vpop.permute.xlu0 %1644 }
 0x20a   : > { %v1665_v38 = vsel %vm969_vm0, %v1656_v7, %v1643_v18  ;;  %v1657_v41 = vrot.slane %v1645_v39, 4 }
 0x20b   : > { %1684 = vst.msk [vmem:[%s2912_s9 + $0x10] sm:$0xff] %vm2953_vm7, %v1665_v38  ;;  %v1639_v33 = vpop.permute.xlu1 %1638 }
 0x20c   : > { %v1666_v62 = vsel %vm969_vm0, %v1657_v41, %v1645_v39  ;;  %v1654_v26 = vrot.slane %v1639_v33, 4 }
 0x20d   : > { %1685 = vst.msk [vmem:[%s2912_s9 + $0x18] sm:$0xff] %vm2953_vm7, %v1666_v62  ;;  %v1641_v5 = vpop.permute.xlu0 %1640 }
 0x20e   : > { %v1663_v22 = vsel %vm969_vm0, %v1654_v26, %v1639_v33  ;;  %v1655_v63 = vrot.slane %v1641_v5, 4 }
 0x20f   : > { %1682 = vst.msk [vmem:[%s2912_s9] sm:$0xff] %vm2953_vm7, %v1663_v22  ;;  %v1647_v11 = vpop.permute.xlu1 %1646 }
 0x210   : > { %v1664_v15 = vsel %vm969_vm0, %v1655_v63, %v1641_v5  ;;  %v1658_v17 = vrot.slane %v1647_v11, 4 }
 0x211   : > { %1683 = vst.msk [vmem:[%s2912_s9 + $0x8] sm:$0xff] %vm2953_vm7, %v1664_v15  ;;  %v1649_v14 = vpop.permute.xlu0 %1648 }
 0x212   : > { %v1667_v42 = vsel %vm969_vm0, %v1658_v17, %v1647_v11  ;;  %v1659_v53 = vrot.slane %v1649_v14, 4 }
 0x213   : > { %1686 = vst.msk [vmem:[%s2912_s9 + $0x20] sm:$0xff] %vm2953_vm7, %v1667_v42  ;;  %v1651_v36 = vpop.permute.xlu1 %1650 }
 0x214   : > { %v1668_v34 = vsel %vm969_vm0, %v1659_v53, %v1649_v14  ;;  %v1660_v48 = vrot.slane %v1651_v36, 4 }
 0x215   : > { %1687 = vst.msk [vmem:[%s2912_s9 + $0x28] sm:$0xff] %vm2953_vm7, %v1668_v34  ;;  %v1653_v47 = vpop.permute.xlu0 %1652 }
 0x216   : > { %v1669_v21 = vsel %vm969_vm0, %v1660_v48, %v1651_v36  ;;  %v1661_v2 = vrot.slane %v1653_v47, 4 }
 0x217   : > { %1688 = vst.msk [vmem:[%s2912_s9 + $0x30] sm:$0xff] %vm2953_vm7, %v1669_v21 }
 0x218   : > { %v1670_v32 = vsel %vm969_vm0, %v1661_v2, %v1653_v47 }
 0x219   : > { %1689 = vst.msk [vmem:[%s2912_s9 + $0x38] sm:$0xff] %vm2953_vm7, %v1670_v32 }
 0x21a   : > { %2184 = shalt.err (!%p2181_p5)
}
 0x21b   : > { %s2185_s30 = scalar_lea.hbm %s2987_s22, 1024  ;;  %s2189_s8 = scalar_lea.hbm %s3050_s4, 2048 }
 0x21c   : > { %p2186_p6 = scmp.ne.s32.totalorder %s2987_s22, %s2185_s30  ;;  %p2190_p10 = scmp.lt.u32.totalorder %s2987_s22, %s3050_s4 }
 0x21d   : > { %p2191_p11 = scmp.lt.u32.totalorder %s2189_s8, %s2185_s30  ;;  %p2193_p13 = scmp.lt.u32.totalorder %s2185_s30, %s2987_s22 }
 0x21e   : > { %p2187_p7 = pnand %p2186_p6, %p2320_p4 }
 0x21f   : > { %p2192_p12 = por %p2191_p11, %p2190_p10 }
 0x220   : > { %p2188_p9 = pneg %p2187_p7 }
 0x221   : > { %p2194_p0 = por %p2193_p13, %p2192_p12 }
 0x223   : > { %p2195_p1 = pnand %p2194_p0, %p2188_p9 }
 0x225   : > { %2198 = shalt.err (!%p2195_p1)
}
 0x226   : > { %s2253_s12 = smov 128   ;;  %s2254_s7 = smov 8  }
 0x227   : > { %2042 = dma.vmem_to_hbm [thread:$0]  (%p2320_p4), %s2989_s13, 1024, %s2987_s22, %s3000_s18, %s2253_s12, %s2253_s12, %s2254_s7  }
 0x228 PF: > { %p2049_p2 = scmp.ge.s32.totalorder %s2249_s20, 2  ;;  %s1722_s14 = sand.u32 1, %s2229_s15  }
 0x229   : > { %s1723_s21 = scalar_lea.sflag [#allocation3], %s1722_s14 }
 0x22a   : > { %p2045_p3 = pnand %p2049_p2, %p2327_p8 }
 0x22c   : > { %2224 = dma.done.wait (!%p2045_p3), %s1723_s21, 1024  }
 0x22d   : > { %2226 = vsyncadd (!%p2045_p3), %s1723_s21, 4294966272  ;;  %s17_s20 = sadd.s32 1, %s2249_s20   ;;  %s3058_s15 = smov %s2233_s16 }
 0x22e   : > { %p14_p5 = scmp.ge.s32.totalorder %s17_s20, 4   ;;  %s3059_s16 = smov %s2237_s17 }
 0x22f   : > { %s3060_s17 = smov %s2333_s28  ;;  %s3061_s18 = smov %s2245_s19 }
 0x230   : > { %s3062_s19 = smov %s3064_s23  ;;  %16 = sbr.rel (!%p14_p5) target bundleno = 4 (0x4), region = 74 }
 0x237   :  { %1728 = vsyncpa [#allocation3], 1 }
 0x238   :  { %1730 = vsyncpa [#allocation3 + $0x1], 1 }

</bundles_post_ra>
